<compile_context>
chip_gen: v7x
topology: tpu7x:2x2x1
jax: 0.10.0
libtpu: 0.0.40
codegen_flags: <defaults>
</compile_context>

<pallas_src>
import jax
import jax.numpy as jnp
import numpy as np
from jax.experimental import pallas as pl
from jax.experimental.pallas import tpu as pltpu


# ---------------------------------------------------------------------------
# Pallas kernel: fused 3-layer (conv-as-GEMM) + bias + ELU forward.
# ---------------------------------------------------------------------------
def _elu(x):
    # nn.ELU(alpha=1): x if x > 0 else exp(x) - 1.  min() keeps exp finite on
    # pad rows.  (exp-1 kept instead of expm1: guaranteed Mosaic lowering; the
    # saved VPU sub per element is negligible next to the DMA/MXU work.)
    return jnp.where(x > 0.0, x, jnp.exp(jnp.minimum(x, 0.0)) - 1.0)


def fused_embed_kernel(x_ref, w1_ref, b1_ref, w2_ref, b2_ref, w3_ref, b3_ref,
                       o_ref):
    # uint8 -> f32 happens here, so HBM/DMA traffic for the activations stays at
    # 1 byte/element.  The module's /255.0 is folded into w1 at repack time.
    x = x_ref[...].astype(jnp.float32)
    h = jnp.dot(x, w1_ref[...], preferred_element_type=jnp.float32) + b1_ref[...]
    h = _elu(h)
    h = jnp.dot(h, w2_ref[...], preferred_element_type=jnp.float32) + b2_ref[...]
    h = _elu(h)
    h = jnp.dot(h, w3_ref[...], preferred_element_type=jnp.float32) + b3_ref[...]
    o_ref[...] = _elu(h)


def _round_up(x, m):
    return ((x + m - 1) // m) * m


def _cdiv(a, b):
    return -(-a // b)


def _choose_m_tiling(n, cap=512, align=32):
    """Pick (tm, n_pad): tm a multiple of 32 (uint8 (32,128) tiling), at most
    ~align rows of pad per tile, and >=2 grid steps when n is large enough so
    the 'parallel' axis can shard across v7x's two TensorCores."""
    if n <= 2 * align:
        num_tiles = 1
    else:
        num_tiles = max(2, _cdiv(n, cap))
    tm = _round_up(_cdiv(n, num_tiles), align)
    num_tiles = _cdiv(n, tm)
    return tm, tm * num_tiles


def minigrid_state_embedding_forward(inputs, fc_params):
    """inputs: (T, B, H, W, C) uint8; fc_params: [(W_fc, bias_row)] * 3."""
    (w1, b1), (w2, b2), (w3, b3) = fc_params
    T, B = inputs.shape[0], inputs.shape[1]
    N = T * B
    K1 = int(np.prod(inputs.shape[2:]))
    D1, D2, D3 = w1.shape[1], w2.shape[1], w3.shape[1]

    x = inputs.reshape(N, K1)                      # stays uint8 (1 B/elem DMA)
    tm, n_pad = _choose_m_tiling(N)
    if n_pad != N:
        x = jnp.pad(x, ((0, n_pad - N), (0, 0)))   # cheap uint8 pad

    out = pl.pallas_call(
        fused_embed_kernel,
        out_shape=jax.ShapeDtypeStruct((n_pad, D3), jnp.float32),
        grid=(n_pad // tm,),
        in_specs=[
            pl.BlockSpec((tm, K1), lambda i: (i, 0)),   # uint8 activations, tiled over M
            pl.BlockSpec((K1, D1), lambda i: (0, 0)),   # weights: VMEM-resident
            pl.BlockSpec((1, D1), lambda i: (0, 0)),
            pl.BlockSpec((D1, D2), lambda i: (0, 0)),
            pl.BlockSpec((1, D2), lambda i: (0, 0)),
            pl.BlockSpec((D2, D3), lambda i: (0, 0)),
            pl.BlockSpec((1, D3), lambda i: (0, 0)),
        ],
        out_specs=pl.BlockSpec((tm, D3), lambda i: (i, 0)),
        compiler_params=pltpu.CompilerParams(
            dimension_semantics=("parallel",)),         # shard M tiles on v7x 2xTC
    )(x, w1, b1, w2, b2, w3, b3)

    return out[:N].reshape(T, B, D3)


# ---------------------------------------------------------------------------
# Parameter init (deterministic orthogonal, gain = calculate_gain('relu'))
# ---------------------------------------------------------------------------
def orthogonal_conv_weight(key, cout, cin, k, gain):
    fan_in = cin * k * k
    a = jax.random.normal(key, (fan_in, cout), dtype=jnp.float32)
    q, r = jnp.linalg.qr(a)                        # orthonormal columns
    q = q * jnp.sign(jnp.diag(r))                  # deterministic sign convention
    return (gain * q.T).reshape(cout, cin, k, k)   # OIHW, rows orthonormal (torch-like)


def init_conv_params(key, obs_channels):
    gain = float(np.sqrt(2.0))                     # nn.init.calculate_gain('relu')
    keys = jax.random.split(key, 3)
    layers = []
    for kk, (cin, cout) in zip(keys, [(obs_channels, 32), (32, 32), (32, 128)]):
        w = orthogonal_conv_weight(kk, cout, cin, 3, gain)
        b = jnp.zeros((cout,), dtype=jnp.float32)
        layers.append((w, b))
    return layers


# ---------------------------------------------------------------------------
# One-time repacking: conv on a fixed tiny grid  ->  dense GEMM weight.
# ---------------------------------------------------------------------------
def _conv_to_fc(w_oihw, ih, iw, stride=2, pad=1):
    """Dense equivalent of a conv on a fixed (ih, iw) grid.
    Input rows flattened channel-last over (h, w, cin); output cols over (oh, ow, cout)."""
    cout, cin, kh, kw = w_oihw.shape
    oh_n = (ih + 2 * pad - kh) // stride + 1
    ow_n = (iw + 2 * pad - kw) // stride + 1
    fc = np.zeros((ih * iw * cin, oh_n * ow_n * cout), np.float32)
    w = np.asarray(w_oihw, np.float32)
    for oh in range(oh_n):
        for ow in range(ow_n):
            c0 = (oh * ow_n + ow) * cout
            for a in range(kh):
                h = oh * stride + a - pad
                if not 0 <= h < ih:
                    continue
                for b in range(kw):
                    ww = ow * stride + b - pad
                    if not 0 <= ww < iw:
                        continue
                    r0 = (h * iw + ww) * cin
                    fc[r0:r0 + cin, c0:c0 + cout] = w[:, :, a, b].T
    return fc, oh_n, ow_n


def _conv1_to_fc(w_oihw, H, W, stride=2, pad=1):
    """Layer-1 variant: PyTorch applies the conv to x.transpose(1, 3), i.e. the
    conv's (H, W) axes are the observation's (W, H) axes, while the kernel input
    is the observation flattened in its native (H, W, C) order."""
    cout, cin, kh, kw = w_oihw.shape
    oi_n = (W + 2 * pad - kh) // stride + 1        # conv-H axis == obs W axis
    oj_n = (H + 2 * pad - kw) // stride + 1        # conv-W axis == obs H axis
    fc = np.zeros((H * W * cin, oi_n * oj_n * cout), np.float32)
    w = np.asarray(w_oihw, np.float32)
    for i in range(oi_n):
        for j in range(oj_n):
            c0 = (i * oj_n + j) * cout
            for a in range(kh):
                wi = i * stride + a - pad          # obs W index
                if not 0 <= wi < W:
                    continue
                for b in range(kw):
                    hi = j * stride + b - pad      # obs H index
                    if not 0 <= hi < H:
                        continue
                    r0 = (hi * W + wi) * cin
                    fc[r0:r0 + cin, c0:c0 + cout] = w[:, :, a, b].T
    return fc, oi_n, oj_n


def conv_params_to_fc(conv_params, observation_shape):
    H, W, C = observation_shape
    (w1, b1), (w2, b2), (w3, b3) = conv_params

    fc1, oi1, oj1 = _conv1_to_fc(np.asarray(w1), H, W)
    fc1 = fc1 * np.float32(1.0 / 255.0)            # fold the module's x/255 into W1
    bf1 = np.tile(np.asarray(b1), oi1 * oj1)

    fc2, oi2, oj2 = _conv_to_fc(np.asarray(w2), oi1, oj1)
    bf2 = np.tile(np.asarray(b2), oi2 * oj2)

    fc3, oi3, oj3 = _conv_to_fc(np.asarray(w3), oi2, oj2)
    bf3 = np.tile(np.asarray(b3), oi3 * oj3)

    # Reorder final columns from (i, j, cout) to torch's NCHW flatten (cout, i, j)
    # so the kernel output matches x.view(T, B, -1) (identity when spatial is 1x1).
    c3 = int(np.asarray(w3).shape[0])
    perm = np.arange(oi3 * oj3 * c3).reshape(oi3, oj3, c3).transpose(2, 0, 1).reshape(-1)
    fc3 = fc3[:, perm]
    bf3 = bf3[perm]

    as_j = lambda a: jnp.asarray(a, dtype=jnp.float32)
    return [(as_j(fc1), as_j(bf1.reshape(1, -1))),
            (as_j(fc2), as_j(bf2.reshape(1, -1))),
            (as_j(fc3), as_j(bf3.reshape(1, -1)))]


# ---------------------------------------------------------------------------
# Pure-JAX reference (mirrors the PyTorch module op-for-op)
# ---------------------------------------------------------------------------
def reference_forward(inputs, conv_params):
    T, B = inputs.shape[0], inputs.shape[1]
    x = inputs.reshape((T * B,) + inputs.shape[2:]).astype(jnp.float32) / 255.0
    x = jnp.transpose(x, (0, 3, 2, 1))             # (N,H,W,C) -> (N,C,W,H) == transpose(1,3)
    for w, b in conv_params:
        x = jax.lax.conv_general_dilated(
            x, w, window_strides=(2, 2), padding=((1, 1), (1, 1)),
            dimension_numbers=('NCHW', 'OIHW', 'NCHW'),
            precision=jax.lax.Precision.HIGHEST)
        x = x + b.reshape(1, -1, 1, 1)
        x = jnp.where(x > 0, x, jnp.exp(jnp.minimum(x, 0.0)) - 1.0)
    return x.reshape(T, B, -1)


if __name__ == "__main__":
    T, B = 4, 2
    observation_shape = (8, 8, 4)                  # (H, W, C)

    key = jax.random.PRNGKey(0)
    k_param, k_input = jax.random.split(key)
    conv_params = init_conv_params(k_param, observation_shape[2])
    fc_params = conv_params_to_fc(conv_params, observation_shape)

    inputs = jax.random.randint(
        k_input, (T, B) + observation_shape, 0, 256, dtype=jnp.int32
    ).astype(jnp.uint8)

    fwd = jax.jit(minigrid_state_embedding_forward)
    out = jax.block_until_ready(fwd(inputs, fc_params))

    ref = jax.block_until_ready(reference_forward(inputs, conv_params))
    assert out.shape == (T, B, 128), out.shape     # 8 -> 4 -> 2 -> 1 spatial, 128 ch
    max_err = float(np.max(np.abs(np.asarray(out) - np.asarray(ref))))
    assert np.allclose(np.asarray(out), np.asarray(ref), rtol=1e-3, atol=1e-3), max_err

    print("KERNEL_OK")
</pallas_src>

<mosaic_0001>
module attributes {stable_mosaic.version = 11 : i64} {
  func.func @fused_embed_kernel(%arg0: i32, %arg1: memref<32x256xi8, #tpu.memory_space<vmem>>, %arg2: memref<256x512xf32, #tpu.memory_space<vmem>>, %arg3: memref<1x512xf32, #tpu.memory_space<vmem>>, %arg4: memref<512x128xf32, #tpu.memory_space<vmem>>, %arg5: memref<1x128xf32, #tpu.memory_space<vmem>>, %arg6: memref<128x128xf32, #tpu.memory_space<vmem>>, %arg7: memref<1x128xf32, #tpu.memory_space<vmem>>, %arg8: memref<32x128xf32, #tpu.memory_space<vmem>>) attributes {dimension_semantics = [#tpu.dimension_semantics<parallel>], iteration_bounds = array<i64: 1>, scalar_prefetch = 0 : i64, scratch_operands = 0 : i64, tpu.core_type = #tpu.core_type<tc>, window_params = [{transform_indices = @transform_0, window_bounds = array<i64: 32, 256>}, {pipeline_mode = #tpu.pipeline_mode<synchronous>, transform_indices = @transform_1, window_bounds = array<i64: 256, 512>}, {pipeline_mode = #tpu.pipeline_mode<synchronous>, transform_indices = @transform_2, window_bounds = array<i64: 1, 512>}, {pipeline_mode = #tpu.pipeline_mode<synchronous>, transform_indices = @transform_3, window_bounds = array<i64: 512, 128>}, {pipeline_mode = #tpu.pipeline_mode<synchronous>, transform_indices = @transform_4, window_bounds = array<i64: 1, 128>}, {pipeline_mode = #tpu.pipeline_mode<synchronous>, transform_indices = @transform_5, window_bounds = array<i64: 128, 128>}, {pipeline_mode = #tpu.pipeline_mode<synchronous>, transform_indices = @transform_6, window_bounds = array<i64: 1, 128>}, {transform_indices = @transform_7, window_bounds = array<i64: 32, 128>}]} {
    %c0 = arith.constant 0 : index
    %c0_0 = arith.constant 0 : index
    %0 = vector.load %arg1[%c0, %c0_0] : memref<32x256xi8, #tpu.memory_space<vmem>>, vector<32x256xi8>
    %1 = arith.uitofp %0 : vector<32x256xi8> to vector<32x256xf32>
    %c0_1 = arith.constant 0 : index
    %c0_2 = arith.constant 0 : index
    %2 = vector.load %arg2[%c0_1, %c0_2] : memref<256x512xf32, #tpu.memory_space<vmem>>, vector<256x512xf32>
    %cst = arith.constant dense<0.000000e+00> : vector<32x512xf32>
    %3 = tpu.matmul %1, %2, %cst {dimension_numbers = #tpu.dot_dimension_numbers<[1], [0], [0], [1], [0, 0, 1, 1], [], []>} : vector<32x256xf32>, vector<256x512xf32>, vector<32x512xf32> -> vector<32x512xf32>
    %c0_3 = arith.constant 0 : index
    %c0_4 = arith.constant 0 : index
    %4 = vector.load %arg3[%c0_3, %c0_4] : memref<1x512xf32, #tpu.memory_space<vmem>>, vector<1x512xf32>
    %5 = vector.broadcast %4 : vector<1x512xf32> to vector<32x512xf32>
    %6 = arith.addf %3, %5 : vector<32x512xf32>
    %cst_5 = arith.constant 0.000000e+00 : f32
    %7 = vector.broadcast %cst_5 : f32 to vector<32x512xf32>
    %8 = arith.cmpf ogt, %6, %7 : vector<32x512xf32>
    %cst_6 = arith.constant 0.000000e+00 : f32
    %9 = vector.broadcast %cst_6 : f32 to vector<32x512xf32>
    %10 = arith.minimumf %6, %9 : vector<32x512xf32>
    %11 = math.exp %10 : vector<32x512xf32>
    %cst_7 = arith.constant 1.000000e+00 : f32
    %12 = vector.broadcast %cst_7 : f32 to vector<32x512xf32>
    %13 = arith.subf %11, %12 : vector<32x512xf32>
    %14 = arith.select %8, %6, %13 : vector<32x512xi1>, vector<32x512xf32>
    %c0_8 = arith.constant 0 : index
    %c0_9 = arith.constant 0 : index
    %15 = vector.load %arg4[%c0_8, %c0_9] : memref<512x128xf32, #tpu.memory_space<vmem>>, vector<512x128xf32>
    %cst_10 = arith.constant dense<0.000000e+00> : vector<32x128xf32>
    %16 = tpu.matmul %14, %15, %cst_10 {dimension_numbers = #tpu.dot_dimension_numbers<[1], [0], [0], [1], [0, 0, 1, 1], [], []>} : vector<32x512xf32>, vector<512x128xf32>, vector<32x128xf32> -> vector<32x128xf32>
    %c0_11 = arith.constant 0 : index
    %c0_12 = arith.constant 0 : index
    %17 = vector.load %arg5[%c0_11, %c0_12] : memref<1x128xf32, #tpu.memory_space<vmem>>, vector<1x128xf32>
    %18 = vector.broadcast %17 : vector<1x128xf32> to vector<32x128xf32>
    %19 = arith.addf %16, %18 : vector<32x128xf32>
    %cst_13 = arith.constant 0.000000e+00 : f32
    %20 = vector.broadcast %cst_13 : f32 to vector<32x128xf32>
    %21 = arith.cmpf ogt, %19, %20 : vector<32x128xf32>
    %cst_14 = arith.constant 0.000000e+00 : f32
    %22 = vector.broadcast %cst_14 : f32 to vector<32x128xf32>
    %23 = arith.minimumf %19, %22 : vector<32x128xf32>
    %24 = math.exp %23 : vector<32x128xf32>
    %cst_15 = arith.constant 1.000000e+00 : f32
    %25 = vector.broadcast %cst_15 : f32 to vector<32x128xf32>
    %26 = arith.subf %24, %25 : vector<32x128xf32>
    %27 = arith.select %21, %19, %26 : vector<32x128xi1>, vector<32x128xf32>
    %c0_16 = arith.constant 0 : index
    %c0_17 = arith.constant 0 : index
    %28 = vector.load %arg6[%c0_16, %c0_17] : memref<128x128xf32, #tpu.memory_space<vmem>>, vector<128x128xf32>
    %cst_18 = arith.constant dense<0.000000e+00> : vector<32x128xf32>
    %29 = tpu.matmul %27, %28, %cst_18 {dimension_numbers = #tpu.dot_dimension_numbers<[1], [0], [0], [1], [0, 0, 1, 1], [], []>} : vector<32x128xf32>, vector<128x128xf32>, vector<32x128xf32> -> vector<32x128xf32>
    %c0_19 = arith.constant 0 : index
    %c0_20 = arith.constant 0 : index
    %30 = vector.load %arg7[%c0_19, %c0_20] : memref<1x128xf32, #tpu.memory_space<vmem>>, vector<1x128xf32>
    %31 = vector.broadcast %30 : vector<1x128xf32> to vector<32x128xf32>
    %32 = arith.addf %29, %31 : vector<32x128xf32>
    %cst_21 = arith.constant 0.000000e+00 : f32
    %33 = vector.broadcast %cst_21 : f32 to vector<32x128xf32>
    %34 = arith.cmpf ogt, %32, %33 : vector<32x128xf32>
    %cst_22 = arith.constant 0.000000e+00 : f32
    %35 = vector.broadcast %cst_22 : f32 to vector<32x128xf32>
    %36 = arith.minimumf %32, %35 : vector<32x128xf32>
    %37 = math.exp %36 : vector<32x128xf32>
    %cst_23 = arith.constant 1.000000e+00 : f32
    %38 = vector.broadcast %cst_23 : f32 to vector<32x128xf32>
    %39 = arith.subf %37, %38 : vector<32x128xf32>
    %40 = arith.select %34, %32, %39 : vector<32x128xi1>, vector<32x128xf32>
    %c0_24 = arith.constant 0 : index
    %c0_25 = arith.constant 0 : index
    %41 = vector.load %arg8[%c0_24, %c0_25] : memref<32x128xf32, #tpu.memory_space<vmem>>, vector<32x128xf32>
    tpu.vector_store %arg8[%c0_24, %c0_25], %40 {strides = array<i32>} : memref<32x128xf32, #tpu.memory_space<vmem>>, vector<32x128xf32>,
    return
  }
  func.func @transform_0(%arg0: i32) -> (i32, i32) {
    %c0_i32 = arith.constant 0 : i32
    %c0_i32_0 = arith.constant 0 : i32
    return %arg0, %c0_i32 : i32, i32
  }
  func.func @transform_1(%arg0: i32) -> (i32, i32) {
    %c0_i32 = arith.constant 0 : i32
    %c0_i32_0 = arith.constant 0 : i32
    %c0_i32_1 = arith.constant 0 : i32
    return %c0_i32, %c0_i32_0 : i32, i32
  }
  func.func @transform_2(%arg0: i32) -> (i32, i32) {
    %c0_i32 = arith.constant 0 : i32
    %c0_i32_0 = arith.constant 0 : i32
    %c0_i32_1 = arith.constant 0 : i32
    return %c0_i32, %c0_i32_0 : i32, i32
  }
  func.func @transform_3(%arg0: i32) -> (i32, i32) {
    %c0_i32 = arith.constant 0 : i32
    %c0_i32_0 = arith.constant 0 : i32
    %c0_i32_1 = arith.constant 0 : i32
    return %c0_i32, %c0_i32_0 : i32, i32
  }
  func.func @transform_4(%arg0: i32) -> (i32, i32) {
    %c0_i32 = arith.constant 0 : i32
    %c0_i32_0 = arith.constant 0 : i32
    %c0_i32_1 = arith.constant 0 : i32
    return %c0_i32, %c0_i32_0 : i32, i32
  }
  func.func @transform_5(%arg0: i32) -> (i32, i32) {
    %c0_i32 = arith.constant 0 : i32
    %c0_i32_0 = arith.constant 0 : i32
    %c0_i32_1 = arith.constant 0 : i32
    return %c0_i32, %c0_i32_0 : i32, i32
  }
  func.func @transform_6(%arg0: i32) -> (i32, i32) {
    %c0_i32 = arith.constant 0 : i32
    %c0_i32_0 = arith.constant 0 : i32
    %c0_i32_1 = arith.constant 0 : i32
    return %c0_i32, %c0_i32_0 : i32, i32
  }
  func.func @transform_7(%arg0: i32) -> (i32, i32) {
    %c0_i32 = arith.constant 0 : i32
    %c0_i32_0 = arith.constant 0 : i32
    return %arg0, %c0_i32 : i32, i32
  }
}

</mosaic_0001>

<bundles_post_ra>
// kernel: minigrid_state_embedding_forward.1
= control target key start
LH: loop header
LB: loop body
LE: loop exit
PB: predicated region body
PF: predicated region fallthrough
CT: control target
= control target key end

     0   :  { %12 = vsyncpa [#allocation3], 0  ;;  %s1680_s0 = inlined_call_operand.vmem [shape: u8[32,256], index: 0, kind: input, shape index: {}]   ;;  %s1681_s1 = inlined_call_operand.hbm [shape: f32[256,512], index: 1, kind: input, shape index: {}]   ;;  %s1682_s2 = inlined_call_operand.vmem [shape: f32[1,512], index: 2, kind: input, shape index: {}]   ;;  %s1683_s3 = inlined_call_operand.hbm [shape: f32[512,128], index: 3, kind: input, shape index: {}]   ;;  %s1684_s4 = inlined_call_operand.vmem [shape: f32[1,128], index: 4, kind: input, shape index: {}]   ;;  %s1685_s5 = inlined_call_operand.vmem [shape: f32[128,128], index: 5, kind: input, shape index: {}]   ;;  %s1686_s6 = inlined_call_operand.vmem [shape: f32[1,128], index: 6, kind: input, shape index: {}]   ;;  %s1687_s7 = inlined_call_operand.vmem [shape: f32[32,128], index: 7, kind: output, shape index: {}]  }
   0x1   :  { %13 = vsyncpa [#allocation5], 0  ;;  %s1425_s24 = smov [#allocation2]   ;;  %s1377_s28 = scalar_lea.hbm %s1681_s1, 16384 }
   0x2   :  { %s21_s25 = sshll.u32 %s1425_s24, 4  ;;  %p1378_p0 = scmp.ne.s32.totalorder %s1681_s1, %s1377_s28  ;;  %s22_s25 = int_to_ptr.vmem [resolvable:$true] %s21_s25 }
   0x3   :  { %p1381_p1 = scmp.lt.u32.totalorder %s1377_s28, %s1681_s1 }
   0x5   :  { %p1383_p2 = pnand %p1381_p1, %p1378_p0 }
   0x7   :  { %1386 = shalt.err (!%p1383_p2)
}
   0x8   :  { %s1387_s10 = scalar_lea.vmem %s22_s25, 16384  ;;  %p1392_p4 = scmp.lt.s32.totalorder %s22_s25, %s22_s25 }
   0x9   :  { %p1388_p3 = scmp.ne.s32.totalorder %s22_s25, %s1387_s10  ;;  %p1393_p5 = scmp.lt.s32.totalorder %s1387_s10, %s1387_s10 }
   0xb   :  { %p1394_p6 = por %p1393_p5, %p1392_p4 }
   0xd   :  { %p1395_p7 = pnand %p1394_p6, %p1388_p3 }
   0xf   :  { %1398 = shalt.err (!%p1395_p7)
}
  0x10   :  { %s1426_s11 = smov 512   ;;  %s1427_s12 = smov 32  }
  0x11   :  { %27 = dma.hbm_to_vmem [thread:$0]  %s1681_s1, 16384, %s22_s25, [#allocation3], %s1426_s11, %s1426_s11, %s1427_s12  }
  0x12   :  { %s1428_s15 = smov [#allocation4]   ;;  %s1399_s19 = scalar_lea.hbm %s1683_s3, 8192 }
  0x13   :  { %s35_s16 = sshll.u32 %s1428_s15, 4  ;;  %p1400_p8 = scmp.ne.s32.totalorder %s1683_s3, %s1399_s19  ;;  %s36_s16 = int_to_ptr.vmem [resolvable:$true] %s35_s16 }
  0x14   :  { %p1403_p9 = scmp.lt.u32.totalorder %s1399_s19, %s1683_s3 }
  0x16   :  { %p1405_p10 = pnand %p1403_p9, %p1400_p8 }
  0x18   :  { %1408 = shalt.err (!%p1405_p10)
}
  0x19   :  { %s1409_s24 = scalar_lea.vmem %s36_s16, 8192  ;;  %p1414_p12 = scmp.lt.s32.totalorder %s36_s16, %s36_s16 }
  0x1a   :  { %p1410_p11 = scmp.ne.s32.totalorder %s36_s16, %s1409_s24  ;;  %p1415_p13 = scmp.lt.s32.totalorder %s1409_s24, %s1409_s24 }
  0x1c   :  { %p1416_p0 = por %p1415_p13, %p1414_p12 }
  0x1e   :  { %p1417_p1 = pnand %p1416_p0, %p1410_p11 }
  0x20   :  { %1420 = shalt.err (!%p1417_p1)
}
  0x21   :  { %s1429_s1 = smov 128   ;;  %s1430_s25 = smov 8  }
  0x22   :  { %41 = dma.hbm_to_vmem [thread:$0]  %s1683_s3, 8192, %s36_s16, [#allocation5], %s1429_s1, %s1429_s1, %s1430_s25  }
  0x23   :  { %1421 = dma.done.wait [#allocation3], 16384  }
  0x24   :  { %1422 = vsyncadd [#allocation3], 4294950912 }
  0x25   :  { %1423 = dma.done.wait [#allocation5], 8192  }
  0x26   :  { %1424 = vsyncadd [#allocation5], 4294959104  ;;  %v81_v0 = vld [vmem:[#allocation2 + $0x8] sm:$0xff]  ;;  %v83_v2 = vld [vmem:[#allocation2 + $0x18] sm:$0xff] }
  0x27   :  { %v85_v1 = vld [vmem:[#allocation2 + $0x28] sm:$0xff]  ;;  %v87_v4 = vld [vmem:[#allocation2 + $0x38] sm:$0xff]  ;;  %v80_v5 = vld [vmem:[#allocation2] sm:$0xff] }
  0x28   :  { %v1083_v3 = vpack.c.bf16 %v85_v1, %v81_v0  ;;  %v84_v6 = vld [vmem:[#allocation2 + $0x20] sm:$0xff]  ;;  %v1147_v7 = vpack.c.bf16 %v87_v4, %v83_v2  ;;  %v82_v9 = vld [vmem:[#allocation2 + $0x10] sm:$0xff]  ;;  %v89_v11 = vld [vmem:[#allocation2 + $0x48] sm:$0xff] }
  0x29   :  { %v1085_v8 = vpack.c.bf16 %v84_v6, %v80_v5  ;;  %v86_v10 = vld [vmem:[#allocation2 + $0x30] sm:$0xff]  ;;  %v93_v13 = vld [vmem:[#allocation2 + $0x68] sm:$0xff]  ;;  %v91_v14 = vld [vmem:[#allocation2 + $0x58] sm:$0xff] }
  0x2a   :  { %1084 = vmatprep.subr.bf16.mxu0 %v1083_v3  ;;  %v1149_v12 = vpack.c.bf16 %v86_v10, %v82_v9  ;;  %v95_v15 = vld [vmem:[#allocation2 + $0x78] sm:$0xff]  ;;  %1148 = vmatprep.subr.bf16.mxu1 %v1147_v7  ;;  %v1087_v16 = vpack.c.bf16 %v93_v13, %v89_v11  ;;  %v88_v18 = vld [vmem:[#allocation2 + $0x40] sm:$0xff]  ;;  %v90_v20 = vld [vmem:[#allocation2 + $0x50] sm:$0xff] }
  0x2b   :  { %1086 = vmatpush1.bf16.msra.mxu0 %v1085_v8  ;;  %v1151_v17 = vpack.c.bf16 %v95_v15, %v91_v14  ;;  %v92_v19 = vld [vmem:[#allocation2 + $0x60] sm:$0xff]  ;;  %v94_v22 = vld [vmem:[#allocation2 + $0x70] sm:$0xff]  ;;  %v97_v23 = vld [vmem:[#allocation2 + $0x88] sm:$0xff] }
  0x2c   :  { %1150 = vmatpush1.bf16.msra.mxu1 %v1149_v12  ;;  %v1089_v21 = vpack.c.bf16 %v92_v19, %v88_v18  ;;  %v101_v24 = vld [vmem:[#allocation2 + $0xa8] sm:$0xff]  ;;  %1088 = vmatprep.subr.bf16.mxu0 %v1087_v16  ;;  %v1153_v25 = vpack.c.bf16 %v94_v22, %v90_v20  ;;  %v99_v27 = vld [vmem:[#allocation2 + $0x98] sm:$0xff]  ;;  %v96_v29 = vld [vmem:[#allocation2 + $0x80] sm:$0xff] }
  0x2d   :  { %1152 = vmatprep.subr.bf16.mxu1 %v1151_v17  ;;  %v1091_v26 = vpack.c.bf16 %v101_v24, %v97_v23  ;;  %v103_v28 = vld [vmem:[#allocation2 + $0xb8] sm:$0xff]  ;;  %v100_v31 = vld [vmem:[#allocation2 + $0xa0] sm:$0xff]  ;;  %v98_v32 = vld [vmem:[#allocation2 + $0x90] sm:$0xff] }
  0x2e   :  { %v1155_v30 = vpack.c.bf16 %v103_v28, %v99_v27  ;;  %v102_v33 = vld [vmem:[#allocation2 + $0xb0] sm:$0xff]  ;;  %v1093_v34 = vpack.c.bf16 %v100_v31, %v96_v29  ;;  %v105_v35 = vld [vmem:[#allocation2 + $0xc8] sm:$0xff]  ;;  %v107_v37 = vld [vmem:[#allocation2 + $0xd8] sm:$0xff] }
  0x2f   :  { %1090 = vmatpush1.bf16.msra.mxu0 %v1089_v21  ;;  %v109_v36 = vld [vmem:[#allocation2 + $0xe8] sm:$0xff]  ;;  %v1157_v38 = vpack.c.bf16 %v102_v33, %v98_v32  ;;  %v111_v40 = vld [vmem:[#allocation2 + $0xf8] sm:$0xff]  ;;  %v104_v41 = vld [vmem:[#allocation2 + $0xc0] sm:$0xff] }
  0x30   :  { %1154 = vmatpush1.bf16.msra.mxu1 %v1153_v25  ;;  %1092 = vmatprep.subr.bf16.mxu0 %v1091_v26  ;;  %v1095_v39 = vpack.c.bf16 %v109_v36, %v105_v35  ;;  %v108_v42 = vld [vmem:[#allocation2 + $0xe0] sm:$0xff]  ;;  %v1159_v43 = vpack.c.bf16 %v111_v40, %v107_v37  ;;  %v106_v44 = vld [vmem:[#allocation2 + $0xd0] sm:$0xff]  ;;  %v113_v46 = vld [vmem:[#allocation2 + $0x108] sm:$0xff] }
  0x31   :  { %1156 = vmatprep.subr.bf16.mxu1 %v1155_v30  ;;  %v110_v45 = vld [vmem:[#allocation2 + $0xf0] sm:$0xff]  ;;  %v117_v47 = vld [vmem:[#allocation2 + $0x128] sm:$0xff]  ;;  %v115_v48 = vld [vmem:[#allocation2 + $0x118] sm:$0xff]  ;;  %v1097_v50 = vpack.c.bf16 %v108_v42, %v104_v41 }
  0x32   :  { %v119_v49 = vld [vmem:[#allocation2 + $0x138] sm:$0xff]  ;;  %v1161_v51 = vpack.c.bf16 %v110_v45, %v106_v44  ;;  %v1099_v52 = vpack.c.bf16 %v117_v47, %v113_v46  ;;  %v112_v53 = vld [vmem:[#allocation2 + $0x100] sm:$0xff]  ;;  %v114_v55 = vld [vmem:[#allocation2 + $0x110] sm:$0xff] }
  0x33   :  { %1094 = vmatpush1.bf16.msra.mxu0 %v1093_v34  ;;  %v116_v54 = vld [vmem:[#allocation2 + $0x120] sm:$0xff]  ;;  %v1163_v56 = vpack.c.bf16 %v119_v49, %v115_v48  ;;  %v118_v57 = vld [vmem:[#allocation2 + $0x130] sm:$0xff]  ;;  %v121_v58 = vld [vmem:[#allocation2 + $0x148] sm:$0xff] }
  0x34   :  { %1158 = vmatpush1.bf16.msra.mxu1 %v1157_v38  ;;  %1096 = vmatprep.subr.bf16.mxu0 %v1095_v39  ;;  %v125_v59 = vld [vmem:[#allocation2 + $0x168] sm:$0xff]  ;;  %v123_v60 = vld [vmem:[#allocation2 + $0x158] sm:$0xff]  ;;  %v1101_v62 = vpack.c.bf16 %v116_v54, %v112_v53  ;;  %v1165_v63 = vpack.c.bf16 %v118_v57, %v114_v55  ;;  %v120_v1 = vld [vmem:[#allocation2 + $0x140] sm:$0xff] }
  0x35   :  { %1160 = vmatprep.subr.bf16.mxu1 %v1159_v43  ;;  %v127_v61 = vld [vmem:[#allocation2 + $0x178] sm:$0xff]  ;;  %v1103_v0 = vpack.c.bf16 %v125_v59, %v121_v58  ;;  %v124_v2 = vld [vmem:[#allocation2 + $0x160] sm:$0xff]  ;;  %v122_v3 = vld [vmem:[#allocation2 + $0x150] sm:$0xff] }
  0x36   :  { %v1167_v4 = vpack.c.bf16 %v127_v61, %v123_v60  ;;  %v126_v5 = vld [vmem:[#allocation2 + $0x170] sm:$0xff]  ;;  %v129_v6 = vld [vmem:[#allocation2 + $0x188] sm:$0xff]  ;;  %v131_v8 = vld [vmem:[#allocation2 + $0x198] sm:$0xff]  ;;  %v1105_v10 = vpack.c.bf16 %v124_v2, %v120_v1 }
  0x37   :  { %1098 = vmatpush1.bf16.msra.mxu0 %v1097_v50  ;;  %v133_v7 = vld [vmem:[#allocation2 + $0x1a8] sm:$0xff]  ;;  %v135_v9 = vld [vmem:[#allocation2 + $0x1b8] sm:$0xff]  ;;  %v1169_v11 = vpack.c.bf16 %v126_v5, %v122_v3  ;;  %v128_v13 = vld [vmem:[#allocation2 + $0x180] sm:$0xff] }
  0x38   :  { %1162 = vmatpush1.bf16.msra.mxu1 %v1161_v51  ;;  %1100 = vmatprep.subr.bf16.mxu0 %v1099_v52  ;;  %v1107_v12 = vpack.c.bf16 %v133_v7, %v129_v6  ;;  %v132_v14 = vld [vmem:[#allocation2 + $0x1a0] sm:$0xff]  ;;  %v130_v15 = vld [vmem:[#allocation2 + $0x190] sm:$0xff]  ;;  %v1171_v16 = vpack.c.bf16 %v135_v9, %v131_v8  ;;  %v137_v18 = vld [vmem:[#allocation2 + $0x1c8] sm:$0xff] }
  0x39   :  { %1164 = vmatprep.subr.bf16.mxu1 %v1163_v56  ;;  %v134_v17 = vld [vmem:[#allocation2 + $0x1b0] sm:$0xff]  ;;  %v141_v19 = vld [vmem:[#allocation2 + $0x1e8] sm:$0xff]  ;;  %v139_v20 = vld [vmem:[#allocation2 + $0x1d8] sm:$0xff]  ;;  %v1109_v22 = vpack.c.bf16 %v132_v14, %v128_v13 }
  0x3a   :  { %v143_v21 = vld [vmem:[#allocation2 + $0x1f8] sm:$0xff]  ;;  %v1173_v23 = vpack.c.bf16 %v134_v17, %v130_v15  ;;  %v1111_v24 = vpack.c.bf16 %v141_v19, %v137_v18  ;;  %v136_v25 = vld [vmem:[#allocation2 + $0x1c0] sm:$0xff]  ;;  %v138_v27 = vld [vmem:[#allocation2 + $0x1d0] sm:$0xff] }
  0x3b   :  { %1102 = vmatpush1.bf16.msra.mxu0 %v1101_v62  ;;  %v140_v26 = vld [vmem:[#allocation2 + $0x1e0] sm:$0xff]  ;;  %v1175_v28 = vpack.c.bf16 %v143_v21, %v139_v20  ;;  %v142_v29 = vld [vmem:[#allocation2 + $0x1f0] sm:$0xff]  ;;  %v145_v30 = vld [vmem:[#allocation2 + $0x208] sm:$0xff] }
  0x3c   :  { %1166 = vmatpush1.bf16.msra.mxu1 %v1165_v63  ;;  %1104 = vmatprep.subr.bf16.mxu0 %v1103_v0  ;;  %v149_v31 = vld [vmem:[#allocation2 + $0x228] sm:$0xff]  ;;  %v147_v32 = vld [vmem:[#allocation2 + $0x218] sm:$0xff]  ;;  %v1113_v34 = vpack.c.bf16 %v140_v26, %v136_v25  ;;  %v1177_v35 = vpack.c.bf16 %v142_v29, %v138_v27  ;;  %v144_v37 = vld [vmem:[#allocation2 + $0x200] sm:$0xff] }
  0x3d   :  { %1168 = vmatprep.subr.bf16.mxu1 %v1167_v4  ;;  %v151_v33 = vld [vmem:[#allocation2 + $0x238] sm:$0xff]  ;;  %v1115_v36 = vpack.c.bf16 %v149_v31, %v145_v30  ;;  %v148_v38 = vld [vmem:[#allocation2 + $0x220] sm:$0xff]  ;;  %v146_v39 = vld [vmem:[#allocation2 + $0x210] sm:$0xff] }
  0x3e   :  { %v1179_v40 = vpack.c.bf16 %v151_v33, %v147_v32  ;;  %v150_v41 = vld [vmem:[#allocation2 + $0x230] sm:$0xff]  ;;  %v153_v42 = vld [vmem:[#allocation2 + $0x248] sm:$0xff]  ;;  %v155_v44 = vld [vmem:[#allocation2 + $0x258] sm:$0xff]  ;;  %v1117_v46 = vpack.c.bf16 %v148_v38, %v144_v37 }
  0x3f   :  { %1106 = vmatpush1.bf16.msra.mxu0 %v1105_v10  ;;  %v157_v43 = vld [vmem:[#allocation2 + $0x268] sm:$0xff]  ;;  %v159_v45 = vld [vmem:[#allocation2 + $0x278] sm:$0xff]  ;;  %v1181_v47 = vpack.c.bf16 %v150_v41, %v146_v39  ;;  %v152_v49 = vld [vmem:[#allocation2 + $0x240] sm:$0xff] }
  0x40   :  { %1170 = vmatpush1.bf16.msra.mxu1 %v1169_v11  ;;  %1108 = vmatprep.subr.bf16.mxu0 %v1107_v12  ;;  %v1119_v48 = vpack.c.bf16 %v157_v43, %v153_v42  ;;  %v156_v50 = vld [vmem:[#allocation2 + $0x260] sm:$0xff]  ;;  %v154_v51 = vld [vmem:[#allocation2 + $0x250] sm:$0xff]  ;;  %v1183_v52 = vpack.c.bf16 %v159_v45, %v155_v44  ;;  %v161_v54 = vld [vmem:[#allocation2 + $0x288] sm:$0xff] }
  0x41   :  { %1172 = vmatprep.subr.bf16.mxu1 %v1171_v16  ;;  %v158_v53 = vld [vmem:[#allocation2 + $0x270] sm:$0xff]  ;;  %v165_v55 = vld [vmem:[#allocation2 + $0x2a8] sm:$0xff]  ;;  %v163_v56 = vld [vmem:[#allocation2 + $0x298] sm:$0xff]  ;;  %v1121_v58 = vpack.c.bf16 %v156_v50, %v152_v49 }
  0x42   :  { %v167_v57 = vld [vmem:[#allocation2 + $0x2b8] sm:$0xff]  ;;  %v1185_v59 = vpack.c.bf16 %v158_v53, %v154_v51  ;;  %v1123_v60 = vpack.c.bf16 %v165_v55, %v161_v54  ;;  %v160_v61 = vld [vmem:[#allocation2 + $0x280] sm:$0xff]  ;;  %v162_v63 = vld [vmem:[#allocation2 + $0x290] sm:$0xff] }
  0x43   :  { %1110 = vmatpush1.bf16.msra.mxu0 %v1109_v22  ;;  %v164_v62 = vld [vmem:[#allocation2 + $0x2a0] sm:$0xff]  ;;  %v1187_v0 = vpack.c.bf16 %v167_v57, %v163_v56  ;;  %v166_v1 = vld [vmem:[#allocation2 + $0x2b0] sm:$0xff]  ;;  %v169_v2 = vld [vmem:[#allocation2 + $0x2c8] sm:$0xff] }
  0x44   :  { %1174 = vmatpush1.bf16.msra.mxu1 %v1173_v23  ;;  %1112 = vmatprep.subr.bf16.mxu0 %v1111_v24  ;;  %v173_v3 = vld [vmem:[#allocation2 + $0x2e8] sm:$0xff]  ;;  %v171_v4 = vld [vmem:[#allocation2 + $0x2d8] sm:$0xff]  ;;  %v1125_v6 = vpack.c.bf16 %v164_v62, %v160_v61  ;;  %v168_v7 = vld [vmem:[#allocation2 + $0x2c0] sm:$0xff]  ;;  %v1189_v8 = vpack.c.bf16 %v166_v1, %v162_v63 }
  0x45   :  { %1176 = vmatprep.subr.bf16.mxu1 %v1175_v28  ;;  %v175_v5 = vld [vmem:[#allocation2 + $0x2f8] sm:$0xff]  ;;  %v1127_v9 = vpack.c.bf16 %v173_v3, %v169_v2  ;;  %v172_v10 = vld [vmem:[#allocation2 + $0x2e0] sm:$0xff]  ;;  %v170_v11 = vld [vmem:[#allocation2 + $0x2d0] sm:$0xff] }
  0x46   :  { %v174_v12 = vld [vmem:[#allocation2 + $0x2f0] sm:$0xff]  ;;  %v1191_v13 = vpack.c.bf16 %v175_v5, %v171_v4  ;;  %v177_v14 = vld [vmem:[#allocation2 + $0x308] sm:$0xff]  ;;  %v179_v17 = vld [vmem:[#allocation2 + $0x318] sm:$0xff]  ;;  %v1129_v20 = vpack.c.bf16 %v172_v10, %v168_v7 }
  0x47   :  { %1114 = vmatpush1.bf16.msra.mxu0 %v1113_v34  ;;  %v181_v15 = vld [vmem:[#allocation2 + $0x328] sm:$0xff]  ;;  %v183_v18 = vld [vmem:[#allocation2 + $0x338] sm:$0xff]  ;;  %v1193_v21 = vpack.c.bf16 %v174_v12, %v170_v11  ;;  %v176_v23 = vld [vmem:[#allocation2 + $0x300] sm:$0xff] }
  0x48   :  { %1178 = vmatpush1.bf16.msra.mxu1 %v1177_v35  ;;  %1116 = vmatprep.subr.bf16.mxu0 %v1115_v36  ;;  %v1498_v16 = vld [vmem:[%s1680_s0 + $0x8] sm:$0xff]  ;;  %v1131_v22 = vpack.c.bf16 %v181_v15, %v177_v14  ;;  %v180_v24 = vld [vmem:[#allocation2 + $0x320] sm:$0xff]  ;;  %v178_v25 = vld [vmem:[#allocation2 + $0x310] sm:$0xff]  ;;  %v1195_v27 = vpack.c.bf16 %v183_v18, %v179_v17 }
  0x49   :  { %1180 = vmatprep.subr.bf16.mxu1 %v1179_v40  ;;  %v57_v19 = vunpack.c.0.s8 %v1498_v16  ;;  %v182_v28 = vld [vmem:[#allocation2 + $0x330] sm:$0xff]  ;;  %v185_v29 = vld [vmem:[#allocation2 + $0x348] sm:$0xff]  ;;  %v187_v31 = vld [vmem:[#allocation2 + $0x358] sm:$0xff]  ;;  %v1133_v34 = vpack.c.bf16 %v180_v24, %v176_v23  ;;  %v59_v61 = vunpack.c.1.s8 %v1498_v16 }
  0x4a   :  { %v189_v30 = vld [vmem:[#allocation2 + $0x368] sm:$0xff]  ;;  %v191_v32 = vld [vmem:[#allocation2 + $0x378] sm:$0xff]  ;;  %v1197_v35 = vpack.c.bf16 %v182_v28, %v178_v25  ;;  %v184_v37 = vld [vmem:[#allocation2 + $0x340] sm:$0xff] }
  0x4b   :  { %1118 = vmatpush1.bf16.msra.mxu0 %v1117_v46  ;;  %v65_v26 = vand.u32 255, %v57_v19  ;;  %v1135_v36 = vpack.c.bf16 %v189_v30, %v185_v29  ;;  %v188_v38 = vld [vmem:[#allocation2 + $0x360] sm:$0xff]  ;;  %v186_v39 = vld [vmem:[#allocation2 + $0x350] sm:$0xff]  ;;  %v1199_v40 = vpack.c.bf16 %v191_v32, %v187_v31  ;;  %v193_v42 = vld [vmem:[#allocation2 + $0x388] sm:$0xff]  ;;  %v67_v12 = vand.u32 255, %v59_v61 }
  0x4c   :  { %1182 = vmatpush1.bf16.msra.mxu1 %v1181_v47  ;;  %1120 = vmatprep.subr.bf16.mxu0 %v1119_v48  ;;  %v190_v41 = vld [vmem:[#allocation2 + $0x370] sm:$0xff]  ;;  %v197_v43 = vld [vmem:[#allocation2 + $0x3a8] sm:$0xff]  ;;  %v195_v44 = vld [vmem:[#allocation2 + $0x398] sm:$0xff]  ;;  %v1137_v46 = vpack.c.bf16 %v188_v38, %v184_v37  ;;  %v63_v29 = vunpack.c.3.s8 %v1498_v16 }
  0x4d   :  { %1184 = vmatprep.subr.bf16.mxu1 %v1183_v52  ;;  %v73_v33 = vcvt.s32.f32 %v65_v26  ;;  %v199_v45 = vld [vmem:[#allocation2 + $0x3b8] sm:$0xff]  ;;  %v1504_v47 = vld [vmem:[%s1680_s0] sm:$0xff]  ;;  %v1201_v48 = vpack.c.bf16 %v190_v41, %v186_v39  ;;  %v1139_v49 = vpack.c.bf16 %v197_v43, %v193_v42  ;;  %v194_v52 = vld [vmem:[#allocation2 + $0x390] sm:$0xff] }
  0x4e   :  { %v192_v50 = vld [vmem:[#allocation2 + $0x380] sm:$0xff]  ;;  %v1203_v53 = vpack.c.bf16 %v199_v45, %v195_v44  ;;  %v198_v54 = vld [vmem:[#allocation2 + $0x3b0] sm:$0xff]  ;;  %v201_v55 = vld [vmem:[#allocation2 + $0x3c8] sm:$0xff]  ;;  %v60_v23 = vunpack.c.2.s8 %v1504_v47  ;;  %v71_v45 = vand.u32 255, %v63_v29 }
  0x4f   :  { %1122 = vmatpush1.bf16.msra.mxu0 %v1121_v58  ;;  %294 = vmatprep.mubr.f32.mxu0 %v73_v33  ;;  %v196_v51 = vld [vmem:[#allocation2 + $0x3a0] sm:$0xff]  ;;  %v205_v56 = vld [vmem:[#allocation2 + $0x3e8] sm:$0xff]  ;;  %v203_v57 = vld [vmem:[#allocation2 + $0x3d8] sm:$0xff]  ;;  %v1205_v62 = vpack.c.bf16 %v198_v54, %v194_v52 }
  0x50   :  { %1186 = vmatpush1.bf16.msra.mxu1 %v1185_v59  ;;  %1124 = vmatprep.subr.bf16.mxu0 %v1123_v60  ;;  %v207_v58 = vld [vmem:[#allocation2 + $0x3f8] sm:$0xff]  ;;  %v56_v59 = vunpack.c.0.s8 %v1504_v47  ;;  %v1141_v60 = vpack.c.bf16 %v196_v51, %v192_v50  ;;  %v1143_v63 = vpack.c.bf16 %v205_v56, %v201_v55  ;;  %v204_v1 = vld [vmem:[#allocation2 + $0x3e0] sm:$0xff]  ;;  %v202_v2 = vld [vmem:[#allocation2 + $0x3d0] sm:$0xff]  ;;  %v68_v39 = vand.u32 255, %v60_v23 }
  0x51   :  { %1188 = vmatprep.subr.bf16.mxu1 %v1187_v0  ;;  %383 = vmatprep.mubr.f32.mxu1 %v73_v33  ;;  %v200_v0 = vld [vmem:[#allocation2 + $0x3c0] sm:$0xff]  ;;  %v1207_v3 = vpack.c.bf16 %v207_v58, %v203_v57  ;;  %v206_v4 = vld [vmem:[#allocation2 + $0x3f0] sm:$0xff]  ;;  %v553_v10 = vld [vmem:[#allocation4 + $0x188] sm:$0xff]  ;;  %v79_v54 = vcvt.s32.f32 %v71_v45 }
  0x52   :  { %v520_v5 = vld [vmem:[#allocation4 + $0x80] sm:$0xff]  ;;  %v64_v7 = vand.u32 255, %v56_v59  ;;  %v1145_v11 = vpack.c.bf16 %v204_v1, %v200_v0  ;;  %v1209_v14 = vpack.c.bf16 %v206_v4, %v202_v2  ;;  %v505_v19 = vld [vmem:[#allocation4 + $0x8] sm:$0xff]  ;;  %v522_v25 = vld [vmem:[#allocation4 + $0x90] sm:$0xff]  ;;  %v76_v52 = vcvt.s32.f32 %v68_v39 }
  0x53   :  { %1126 = vmatpush1.bf16.msra.mxu0 %v1125_v6  ;;  %v521_v6 = vld [vmem:[#allocation4 + $0x88] sm:$0xff]  ;;  %v504_v18 = vld [vmem:[#allocation4] sm:$0xff]  ;;  %v523_v26 = vld [vmem:[#allocation4 + $0x98] sm:$0xff] }
  0x54   :  { %1190 = vmatpush1.bf16.msra.mxu1 %v1189_v8  ;;  %1128 = vmatprep.subr.bf16.mxu0 %v1127_v9  ;;  %v58_v8 = vunpack.c.1.s8 %v1504_v47  ;;  %v552_v9 = vld [vmem:[#allocation4 + $0x180] sm:$0xff]  ;;  %v1211_v15 = vpack.c.bf16 %v521_v6, %v520_v5  ;;  %v537_v24 = vld [vmem:[#allocation4 + $0x108] sm:$0xff]  ;;  %v554_v30 = vld [vmem:[#allocation4 + $0x190] sm:$0xff]  ;;  %v1213_v32 = vpack.c.bf16 %v505_v19, %v504_v18 }
  0x55   :  { %1192 = vmatprep.subr.bf16.mxu1 %v1191_v13  ;;  %v61_v13 = vunpack.c.2.s8 %v1498_v16  ;;  %v1243_v17 = vpack.c.bf16 %v553_v10, %v552_v9  ;;  %v555_v31 = vld [vmem:[#allocation4 + $0x198] sm:$0xff]  ;;  %v538_v37 = vld [vmem:[#allocation4 + $0x110] sm:$0xff]  ;;  %v524_v43 = vld [vmem:[#allocation4 + $0xa0] sm:$0xff] }
  0x56   :  { %v1247_v41 = vpack.c.bf16 %v555_v31, %v554_v30  ;;  %v539_v42 = vld [vmem:[#allocation4 + $0x118] sm:$0xff]  ;;  %v525_v16 = vld [vmem:[#allocation4 + $0xa8] sm:$0xff]  ;;  %v508_v56 = vld [vmem:[#allocation4 + $0x20] sm:$0xff] }
  0x57   :  { %1130 = vmatpush1.bf16.msra.mxu0 %v1129_v20  ;;  %v536_v20 = vld [vmem:[#allocation4 + $0x100] sm:$0xff]  ;;  %v69_v28 = vand.u32 255, %v61_v13  ;;  %v1249_v50 = vpack.c.bf16 %v539_v42, %v538_v37  ;;  %v1219_v51 = vpack.c.bf16 %v525_v16, %v524_v43  ;;  %v509_v57 = vld [vmem:[#allocation4 + $0x28] sm:$0xff]  ;;  %v558_v0 = vld [vmem:[#allocation4 + $0x1b0] sm:$0xff] }
  0x58   :  { %1194 = vmatpush1.bf16.msra.mxu1 %v1193_v21  ;;  %1132 = vmatprep.subr.bf16.mxu0 %v1131_v22  ;;  %v72_v21 = vcvt.s32.f32 %v64_v7  ;;  %v66_v22 = vand.u32 255, %v58_v8  ;;  %v1245_v33 = vpack.c.bf16 %v537_v24, %v536_v20  ;;  %v540_v58 = vld [vmem:[#allocation4 + $0x120] sm:$0xff]  ;;  %v1221_v59 = vpack.c.bf16 %v509_v57, %v508_v56  ;;  %v559_v2 = vld [vmem:[#allocation4 + $0x1b8] sm:$0xff]  ;;  %v542_v7 = vld [vmem:[#allocation4 + $0x130] sm:$0xff] }
  0x59   :  { %1196 = vmatprep.subr.bf16.mxu1 %v1195_v27  ;;  %v75_v27 = vcvt.s32.f32 %v67_v12  ;;  %v77_v44 = vcvt.s32.f32 %v69_v28  ;;  %v511_v4 = vld [vmem:[#allocation4 + $0x38] sm:$0xff]  ;;  %v1255_v5 = vpack.c.bf16 %v559_v2, %v558_v0  ;;  %v528_v10 = vld [vmem:[#allocation4 + $0xc0] sm:$0xff]  ;;  %v530_v23 = vld [vmem:[#allocation4 + $0xd0] sm:$0xff] }
  0x5a   :  { %v74_v38 = vcvt.s32.f32 %v66_v22  ;;  %v543_v8 = vld [vmem:[#allocation4 + $0x138] sm:$0xff]  ;;  %v560_v12 = vld [vmem:[#allocation4 + $0x1c0] sm:$0xff]  ;;  %v514_v28 = vld [vmem:[#allocation4 + $0x50] sm:$0xff] }
  0x5b   :  { %1134 = vmatpush1.bf16.msra.mxu0 %v1133_v34  ;;  %v1215_v34 = vpack.c.bf16 %v523_v26, %v522_v25  ;;  %v1257_v9 = vpack.c.bf16 %v543_v8, %v542_v7  ;;  %v544_v20 = vld [vmem:[#allocation4 + $0x140] sm:$0xff]  ;;  %v531_v24 = vld [vmem:[#allocation4 + $0xd8] sm:$0xff]  ;;  %v562_v25 = vld [vmem:[#allocation4 + $0x1d0] sm:$0xff] }
  0x5c   :  { %1198 = vmatpush1.bf16.msra.mxu1 %v1197_v35  ;;  %1136 = vmatprep.subr.bf16.mxu0 %v1135_v36  ;;  %v506_v35 = vld [vmem:[#allocation4 + $0x10] sm:$0xff]  ;;  %v507_v36 = vld [vmem:[#allocation4 + $0x18] sm:$0xff]  ;;  %v1231_v26 = vpack.c.bf16 %v531_v24, %v530_v23  ;;  %v564_v37 = vld [vmem:[#allocation4 + $0x1e0] sm:$0xff] }
  0x5d   :  { %1200 = vmatprep.subr.bf16.mxu1 %v1199_v40  ;;  %v62_v40 = vunpack.c.3.s8 %v1504_v47  ;;  %v515_v29 = vld [vmem:[#allocation4 + $0x58] sm:$0xff]  ;;  %v565_v39 = vld [vmem:[#allocation4 + $0x1e8] sm:$0xff]  ;;  %v548_v16 = vld [vmem:[#allocation4 + $0x160] sm:$0xff] }
  0x5e   :  { %v1233_v31 = vpack.c.bf16 %v515_v29, %v514_v28  ;;  %v1267_v42 = vpack.c.bf16 %v565_v39, %v564_v37  ;;  %v551_v56 = vld [vmem:[#allocation4 + $0x178] sm:$0xff]  ;;  %v208_v0 = vld [vmem:[%s1682_s2] sm:$0xf] }
  0x5f   :  { %1138 = vmatpush1.bf16.msra.mxu0 %v1137_v46  ;;  %v556_v46 = vld [vmem:[#allocation4 + $0x1a0] sm:$0xff]  ;;  %v70_v47 = vand.u32 255, %v62_v40 }
  0x60   :  { %1202 = vmatpush1.bf16.msra.mxu1 %v1201_v48  ;;  %1140 = vmatprep.subr.bf16.mxu0 %v1139_v49  ;;  %v557_v48 = vld [vmem:[#allocation4 + $0x1a8] sm:$0xff]  ;;  %v1217_v49 = vpack.c.bf16 %v507_v36, %v506_v35  ;;  %v532_v35 = vld [vmem:[#allocation4 + $0xe0] sm:$0xff] }
  0x61   :  { %1204 = vmatprep.subr.bf16.mxu1 %v1203_v53  ;;  %v1251_v53 = vpack.c.bf16 %v557_v48, %v556_v46  ;;  %v78_v55 = vcvt.s32.f32 %v70_v47  ;;  %v533_v36 = vld [vmem:[#allocation4 + $0xe8] sm:$0xff]  ;;  %v516_v40 = vld [vmem:[#allocation4 + $0x60] sm:$0xff]  ;;  %v534_v46 = vld [vmem:[#allocation4 + $0xf0] sm:$0xff] }
  0x62   :  { %v535_v48 = vld [vmem:[#allocation4 + $0xf8] sm:$0xff] }
  0x63   :  { %1142 = vmatpush1.bf16.msra.mxu0 %v1141_v60  ;;  %v541_v60 = vld [vmem:[#allocation4 + $0x128] sm:$0xff]  ;;  %v519_v47 = vld [vmem:[#allocation4 + $0x78] sm:$0xff] }
  0x64   :  { %1206 = vmatpush1.bf16.msra.mxu1 %v1205_v62  ;;  %1144 = vmatprep.subr.bf16.mxu0 %v1143_v63  ;;  %v1253_v61 = vpack.c.bf16 %v541_v60, %v540_v58  ;;  %v526_v62 = vld [vmem:[#allocation4 + $0xb0] sm:$0xff]  ;;  %v527_v63 = vld [vmem:[#allocation4 + $0xb8] sm:$0xff]  ;;  %v769_v58 = vld [vmem:[%s1685_s5] sm:$0xff] }
  0x65   :  { %1208 = vmatprep.subr.bf16.mxu1 %v1207_v3  ;;  %v1223_v1 = vpack.c.bf16 %v527_v63, %v526_v62  ;;  %v510_v3 = vld [vmem:[#allocation4 + $0x30] sm:$0xff] }
  0x66   :  { %v1225_v6 = vpack.c.bf16 %v511_v4, %v510_v3 }
  0x67   :  { %1146 = vmatpush1.bf16.msra.mxu0 %v1145_v11  ;;  %v529_v11 = vld [vmem:[#allocation4 + $0xc8] sm:$0xff] }
  0x68   :  { %1210 = vmatpush1.bf16.msra.mxu1 %v1209_v14  ;;  %1212 = vmatprep.subr.bf16.mxu0 %v1211_v15  ;;  %v1227_v13 = vpack.c.bf16 %v529_v11, %v528_v10  ;;  %v561_v14 = vld [vmem:[#allocation4 + $0x1c8] sm:$0xff]  ;;  %v512_v15 = vld [vmem:[#allocation4 + $0x40] sm:$0xff] }
  0x69   :  { %1244 = vmatprep.subr.bf16.mxu1 %v1243_v17  ;;  %v513_v17 = vld [vmem:[#allocation4 + $0x48] sm:$0xff]  ;;  %v1259_v18 = vpack.c.bf16 %v561_v14, %v560_v12 }
  0x6a   :  { %295 = vmatmul.mubr.f32.vlgmr.msra.gmra.mrb[0].mxu0 %v72_v21  ;;  %v1229_v19 = vpack.c.bf16 %v513_v17, %v512_v15 }
  0x6b   :  { %384 = vmatmul.mubr.f32.vlgmr.msra.gmra.mrb[0].mxu1 %v72_v21  ;;  %300 = vmatprep.mubr.f32.mxu0 %v75_v27  ;;  %v545_v21 = vld [vmem:[#allocation4 + $0x148] sm:$0xff] }
  0x6c   :  { %389 = vmatprep.mubr.f32.mxu1 %v75_v27  ;;  %1214 = vmatpush3.bf16.msra.mxu0 %v1213_v32  ;;  %v1261_v22 = vpack.c.bf16 %v545_v21, %v544_v20  ;;  %v563_v27 = vld [vmem:[#allocation4 + $0x1d8] sm:$0xff]  ;;  %v546_v32 = vld [vmem:[#allocation4 + $0x150] sm:$0xff] }
  0x6d   :  { %1246 = vmatpush3.bf16.msra.mxu1 %v1245_v33  ;;  %1216 = vmatprep.subr.bf16.mxu0 %v1215_v34  ;;  %v1263_v30 = vpack.c.bf16 %v563_v27, %v562_v25  ;;  %v547_v33 = vld [vmem:[#allocation4 + $0x158] sm:$0xff] }
  0x6e   :  { %301 = vmatmul.mubr.f32.gmra.mrb[2].mxu0 %v74_v38  ;;  %1248 = vmatprep.subr.bf16.mxu1 %v1247_v41  ;;  %v1265_v34 = vpack.c.bf16 %v547_v33, %v546_v32  ;;  %v517_v41 = vld [vmem:[#allocation4 + $0x68] sm:$0xff] }
  0x6f   :  { %390 = vmatmul.mubr.f32.gmra.mrb[2].mxu1 %v74_v38  ;;  %306 = vmatprep.mubr.f32.mxu0 %v77_v44  ;;  %v1235_v38 = vpack.c.bf16 %v533_v36, %v532_v35  ;;  %v1237_v43 = vpack.c.bf16 %v517_v41, %v516_v40 }
  0x70   :  { %395 = vmatprep.mubr.f32.mxu1 %v77_v44  ;;  %1218 = vmatpush3.bf16.msra.mxu0 %v1217_v49  ;;  %v549_v44 = vld [vmem:[#allocation4 + $0x168] sm:$0xff]  ;;  %v566_v49 = vld [vmem:[#allocation4 + $0x1f0] sm:$0xff] }
  0x71   :  { %1250 = vmatpush3.bf16.msra.mxu1 %v1249_v50  ;;  %1220 = vmatprep.subr.bf16.mxu0 %v1219_v51  ;;  %v1269_v45 = vpack.c.bf16 %v549_v44, %v548_v16  ;;  %v1239_v50 = vpack.c.bf16 %v535_v48, %v534_v46  ;;  %v567_v51 = vld [vmem:[#allocation4 + $0x1f8] sm:$0xff] }
  0x72   :  { %307 = vmatmul.mubr.f32.gmra.mrb[4].mxu0 %v76_v52  ;;  %1252 = vmatprep.subr.bf16.mxu1 %v1251_v53  ;;  %v1271_v53 = vpack.c.bf16 %v567_v51, %v566_v49 }
  0x73   :  { %396 = vmatmul.mubr.f32.gmra.mrb[4].mxu1 %v76_v52  ;;  %312 = vmatprep.mubr.f32.mxu0 %v79_v54  ;;  %v518_v52 = vld [vmem:[#allocation4 + $0x70] sm:$0xff] }
  0x74   :  { %401 = vmatprep.mubr.f32.mxu1 %v79_v54  ;;  %1222 = vmatpush3.bf16.msra.mxu0 %v1221_v59  ;;  %v1241_v54 = vpack.c.bf16 %v519_v47, %v518_v52  ;;  %v770_v59 = vld [vmem:[%s1685_s5 + $0x8] sm:$0xff] }
  0x75   :  { %1254 = vmatpush3.bf16.msra.mxu1 %v1253_v61  ;;  %1224 = vmatprep.subr.bf16.mxu0 %v1223_v1  ;;  %v1519_v60 = vpack.c.bf16 %v770_v59, %v769_v58  ;;  %v210_v61 = vlaneseq }
  0x76   :  { %313 = vmatmul.mubr.f32.gmra.mrb[6].mxu0 %v78_v55  ;;  %1256 = vmatprep.subr.bf16.mxu1 %v1255_v5 }
  0x77   :  { %402 = vmatmul.mubr.f32.gmra.mrb[6].mxu1 %v78_v55  ;;  %v550_v55 = vld [vmem:[#allocation4 + $0x170] sm:$0xff]  ;;  %v211_v62 = vshrl.u32 %v210_v61, 7 }
  0x78   :  { %1226 = vmatpush3.bf16.msra.mxu0 %v1225_v6  ;;  %v1273_v57 = vpack.c.bf16 %v551_v56, %v550_v55 }
  0x79   :  { %1258 = vmatpush3.bf16.msra.mxu1 %v1257_v9  ;;  %1228 = vmatprep.subr.bf16.mxu0 %v1227_v13  ;;  %v212_v63 = vsub.s32 0, %v211_v62  ;;  %v220_v1 = vsub.s32 2, %v211_v62  ;;  %v216_v2 = vsub.s32 1, %v211_v62  ;;  %v224_v3 = vsub.s32 3, %v211_v62 }
  0x7a   :  { %1260 = vmatprep.subr.bf16.mxu1 %v1259_v18 }
  0x7b   :  { %v213_v4 = vrot.slane %v208_v0, %v212_v63  ;;  %v221_v5 = vrot.slane %v208_v0, %v220_v1  ;;  %v1526_v6 = vrot.slane %v208_v0, %v216_v2  ;;  %v1528_v7 = vrot.slane %v208_v0, %v224_v3 }
  0x7c   :  { %1230 = vmatpush3.bf16.msra.mxu0 %v1229_v19 }
  0x7d   :  { %1262 = vmatpush3.bf16.msra.mxu1 %v1261_v22  ;;  %1232 = vmatprep.subr.bf16.mxu0 %v1231_v26 }
  0x7e   :  { %1264 = vmatprep.subr.bf16.mxu1 %v1263_v30 }
  0x80   :  { %1234 = vmatpush3.bf16.msra.mxu0 %v1233_v31 }
  0x81   :  { %1266 = vmatpush3.bf16.msra.mxu1 %v1265_v34  ;;  %1236 = vmatprep.subr.bf16.mxu0 %v1235_v38 }
  0x82   :  { %1268 = vmatprep.subr.bf16.mxu1 %v1267_v42 }
  0x84   :  { %1238 = vmatpush3.bf16.msra.mxu0 %v1237_v43 }
  0x85   :  { %1270 = vmatpush3.bf16.msra.mxu1 %v1269_v45  ;;  %1240 = vmatprep.subr.bf16.mxu0 %v1239_v50 }
  0x86   :  { %1272 = vmatprep.subr.bf16.mxu1 %v1271_v53 }
  0x88   :  { %1242 = vmatpush3.bf16.msra.mxu0 %v1241_v54 }
  0x89   :  { %1274 = vmatpush3.bf16.msra.mxu1 %v1273_v57  ;;  %1276 = vmatprep.subr.bf16.mxu0 %v1519_v60 }
  0x8a   :  { %1307 = vmatprep.subr.bf16.mxu1 %v1519_v60 }
 0x13d   :  { %v296_v8 = vpop.f32.mrb[0].mxu0 }
 0x13e   :  { %v1530_v9 = vadd.f32 %v296_v8, %v213_v4  ;;  %v385_v10 = vpop.f32.mrb[0].mxu1  ;;  %v298_v11 = vpop.f32.mrb[1].mxu0 }
 0x13f   :  { %v1532_v12 = vadd.f32 %v385_v10, %v221_v5  ;;  %v1535_v13 = vadd.f32 %v298_v11, %v1526_v6  ;;  %v387_v14 = vpop.f32.mrb[1].mxu1 }
 0x140   :  { %v424_v15 = vmin.f32 %v1530_v9, 0.0  ;;  %v1539_v17 = vadd.f32 %v387_v14, %v1528_v7  ;;  %vm408_vm1 = vcmp.gt.f32.partialorder %v1530_v9, 0.0 }
 0x141   :  { %v426_v18 = vmin.f32 %v1532_v12, 0.0  ;;  %v425_v19 = vmin.f32 %v1535_v13, 0.0  ;;  %v302_v20 = vpop.f32.mrb[2].mxu0  ;;  %vm409_vm0 = vcmp.gt.f32.partialorder %v1535_v13, 0.0  ;;  %vm410_vm3 = vcmp.gt.f32.partialorder %v1532_v12, 0.0 }
 0x142   :  { %v440_v21 = vmul.f32 1.442695, %v424_v15  ;;  %v427_v22 = vmin.f32 %v1539_v17, 0.0  ;;  %v1544_v23 = vadd.f32 %v302_v20, %v213_v4  ;;  %v391_v24 = vpop.f32.mrb[2].mxu1  ;;  %v304_v25 = vpop.f32.mrb[3].mxu0  ;;  %vm411_vm2 = vcmp.gt.f32.partialorder %v1539_v17, 0.0 }
 0x143   :  { %v444_v26 = vmul.f32 1.442695, %v426_v18  ;;  %v442_v27 = vmul.f32 1.442695, %v425_v19  ;;  %v1546_v28 = vadd.f32 %v391_v24, %v221_v5  ;;  %v1549_v29 = vadd.f32 %v304_v25, %v1526_v6  ;;  %v393_v30 = vpop.f32.mrb[3].mxu1 }
 0x144   :  { %1329 = vpow2.f32 %v440_v21  ;;  %v446_v31 = vmul.f32 1.442695, %v427_v22  ;;  %v428_v32 = vmin.f32 %v1544_v23, 0.0  ;;  %v1553_v33 = vadd.f32 %v393_v30, %v1528_v7 }
 0x145   :  { %1331 = vpow2.f32 %v444_v26  ;;  %v430_v34 = vmin.f32 %v1546_v28, 0.0  ;;  %v429_v35 = vmin.f32 %v1549_v29, 0.0  ;;  %v308_v36 = vpop.f32.mrb[4].mxu0  ;;  %vm413_vm4 = vcmp.gt.f32.partialorder %v1549_v29, 0.0 }
 0x146   :  { %1333 = vpow2.f32 %v442_v27  ;;  %v448_v37 = vmul.f32 1.442695, %v428_v32  ;;  %v431_v38 = vmin.f32 %v1553_v33, 0.0  ;;  %v1558_v39 = vadd.f32 %v308_v36, %v213_v4  ;;  %v397_v40 = vpop.f32.mrb[4].mxu1  ;;  %v310_v41 = vpop.f32.mrb[5].mxu0 }
 0x147   :  { %1335 = vpow2.f32 %v446_v31  ;;  %v452_v42 = vmul.f32 1.442695, %v430_v34  ;;  %v450_v43 = vmul.f32 1.442695, %v429_v35  ;;  %v1560_v16 = vadd.f32 %v397_v40, %v221_v5  ;;  %v399_v44 = vpop.f32.mrb[5].mxu1 }
 0x148   :  { %1337 = vpow2.f32 %v448_v37  ;;  %v454_v45 = vmul.f32 1.442695, %v431_v38  ;;  %v432_v46 = vmin.f32 %v1558_v39, 0.0  ;;  %v1564_v48 = vadd.f32 %v310_v41, %v1526_v6 }
 0x149   :  { %1339 = vpow2.f32 %v452_v42  ;;  %v434_v49 = vmin.f32 %v1560_v16, 0.0  ;;  %v1568_v50 = vadd.f32 %v399_v44, %v1528_v7  ;;  %v314_v51 = vpop.f32.mrb[6].mxu0  ;;  %vm415_vm5 = vcmp.gt.f32.partialorder %v1553_v33, 0.0 }
 0x14a   :  { %1341 = vpow2.f32 %v450_v43  ;;  %v456_v52 = vmul.f32 1.442695, %v432_v46  ;;  %v433_v47 = vmin.f32 %v1564_v48, 0.0  ;;  %v1571_v53 = vadd.f32 %v314_v51, %v213_v4  ;;  %v403_v54 = vpop.f32.mrb[6].mxu1  ;;  %v316_v55 = vpop.f32.mrb[7].mxu0 }
 0x14b   :  { %1343 = vpow2.f32 %v454_v45  ;;  %v460_v56 = vmul.f32 1.442695, %v434_v49  ;;  %v435_v57 = vmin.f32 %v1568_v50, 0.0  ;;  %v1574_v58 = vadd.f32 %v403_v54, %v221_v5  ;;  %v405_v59 = vpop.f32.mrb[7].mxu1 }
 0x14c   :  { %1345 = vpow2.f32 %v456_v52  ;;  %v458_v61 = vmul.f32 1.442695, %v433_v47  ;;  %v436_v62 = vmin.f32 %v1571_v53, 0.0  ;;  %v1578_v63 = vadd.f32 %v316_v55, %v1526_v6 }
 0x14d   :  { %1347 = vpow2.f32 %v460_v56  ;;  %v462_v0 = vmul.f32 1.442695, %v435_v57  ;;  %v438_v1 = vmin.f32 %v1574_v58, 0.0  ;;  %v1582_v2 = vadd.f32 %v405_v59, %v1528_v7  ;;  %v771_v57 = vld [vmem:[%s1685_s5 + $0x10] sm:$0xff]  ;;  %v772_v59 = vld [vmem:[%s1685_s5 + $0x18] sm:$0xff] }
 0x14e   :  { %v1330_v3 = vpop.eup %1329  ;;  %1349 = vpow2.f32 %v458_v61  ;;  %v464_v4 = vmul.f32 1.442695, %v436_v62  ;;  %v437_v5 = vmin.f32 %v1578_v63, 0.0  ;;  %vm412_vm6 = vcmp.gt.f32.partialorder %v1544_v23, 0.0 }
 0x14f   :  { %v1332_v8 = vpop.eup %1331  ;;  %1351 = vpow2.f32 %v462_v0  ;;  %v468_v10 = vmul.f32 1.442695, %v438_v1  ;;  %v439_v11 = vmin.f32 %v1582_v2, 0.0  ;;  %v911_v6 = vadd.f32 -1.0, %v1330_v3  ;;  %v776_v0 = vld [vmem:[%s1685_s5 + $0x38] sm:$0xff]  ;;  %v778_v3 = vld [vmem:[%s1685_s5 + $0x48] sm:$0xff] }
 0x150   :  { %v1334_v14 = vpop.eup %1333  ;;  %1353 = vpow2.f32 %v464_v4  ;;  %v466_v15 = vmul.f32 1.442695, %v437_v5  ;;  %v913_v19 = vadd.f32 -1.0, %v1332_v8  ;;  %vm414_vm7 = vcmp.gt.f32.partialorder %v1546_v28, 0.0  ;;  %v779_v5 = vld [vmem:[%s1685_s5 + $0x50] sm:$0xff]  ;;  %v780_v8 = vld [vmem:[%s1685_s5 + $0x58] sm:$0xff] }
 0x151   :  { %v1336_v18 = vpop.eup %1335  ;;  %1355 = vpow2.f32 %v468_v10  ;;  %v470_v20 = vmul.f32 1.442695, %v439_v11  ;;  %v912_v7 = vadd.f32 -1.0, %v1334_v14  ;;  %v488_v27 = vsel %vm408_vm1, %v1530_v9, %v911_v6  ;;  %v781_v10 = vld [vmem:[%s1685_s5 + $0x60] sm:$0xff]  ;;  %v782_v14 = vld [vmem:[%s1685_s5 + $0x68] sm:$0xff] }
 0x152   :  { %v1338_v21 = vpop.eup %1337  ;;  %1357 = vpow2.f32 %v466_v15  ;;  %v914_v22 = vadd.f32 -1.0, %v1336_v18  ;;  %v490_v34 = vsel %vm410_vm3, %v1532_v12, %v913_v19  ;;  %vm417_vm8 = vcmp.gt.f32.partialorder %v1564_v48, 0.0  ;;  %v783_v15 = vld [vmem:[%s1685_s5 + $0x70] sm:$0xff]  ;;  %v784_v18 = vld [vmem:[%s1685_s5 + $0x78] sm:$0xff] }
 0x153   :  { %v1340_v24 = vpop.eup %1339  ;;  %1359 = vpow2.f32 %v470_v20  ;;  %v489_v25 = vsel %vm409_vm0, %v1535_v13, %v912_v7  ;;  %v915_v31 = vadd.f32 -1.0, %v1338_v21  ;;  %vm419_vm9 = vcmp.gt.f32.partialorder %v1568_v50, 0.0  ;;  %v927_v21 = vld [vmem:[%s1684_s4] ss:$0 sm:$0xff] }
 0x154   :  { %v1342_v26 = vpop.eup %1341  ;;  %639 = vmatprep.mubr.f32.mxu0 %v489_v25  ;;  %v491_v30 = vsel %vm411_vm2, %v1539_v17, %v914_v22  ;;  %v917_v36 = vadd.f32 -1.0, %v1340_v24  ;;  %vm416_vm10 = vcmp.gt.f32.partialorder %v1558_v39, 0.0  ;;  %vm418_vm11 = vcmp.gt.f32.partialorder %v1560_v16, 0.0 }
 0x155   :  { %v1344_v32 = vpop.eup %1343  ;;  %724 = vmatprep.mubr.f32.mxu1 %v491_v30  ;;  %640 = vmatmul.mubr.f32.vlgmr.msra.gmra.mrb[8].mxu0 %v488_v27  ;;  %v916_v35 = vadd.f32 -1.0, %v1342_v26  ;;  %v492_v40 = vsel %vm412_vm6, %v1544_v23, %v915_v31  ;;  %vm421_vm12 = vcmp.gt.f32.partialorder %v1578_v63, 0.0  ;;  %vm423_vm13 = vcmp.gt.f32.partialorder %v1582_v2, 0.0 }
 0x156   :  { %v1346_v37 = vpop.eup %1345  ;;  %725 = vmatmul.mubr.f32.vlgmr.msra.gmra.mrb[8].mxu1 %v490_v34  ;;  %v918_v13 = vadd.f32 -1.0, %v1344_v32  ;;  %1278 = vmatpush3.bf16.msra.mxu0 %v1519_v60  ;;  %vm420_vm14 = vcmp.gt.f32.partialorder %v1571_v53, 0.0  ;;  %vm422_vm15 = vcmp.gt.f32.partialorder %v1574_v58, 0.0  ;;  %v1279_v61 = vpack.c.bf16 %v772_v59, %v771_v57 }
 0x157   :  { %v1348_v9 = vpop.eup %1347  ;;  %v493_v38 = vsel %vm413_vm4, %v1549_v29, %v916_v35  ;;  %1315 = vmatpush3.bf16.msra.mxu1 %v1519_v60  ;;  %v919_v41 = vadd.f32 -1.0, %v1346_v37  ;;  %v494_v29 = vsel %vm414_vm7, %v1546_v28, %v917_v36  ;;  %v1295_v11 = vpack.c.bf16 %v780_v8, %v779_v5 }
 0x158   :  { %v1350_v12 = vpop.eup %1349  ;;  %644 = vmatprep.mubr.f32.mxu0 %v493_v38  ;;  %v495_v17 = vsel %vm415_vm5, %v1553_v33, %v918_v13  ;;  %v921_v44 = vadd.f32 -1.0, %v1348_v9  ;;  %1280 = vmatprep.subr.bf16.mxu0 %v1279_v61  ;;  %v1299_v6 = vpack.c.bf16 %v782_v14, %v781_v10  ;;  %v1303_v19 = vpack.c.bf16 %v784_v18, %v783_v15 }
 0x159   :  { %v1352_v42 = vpop.eup %1351  ;;  %729 = vmatprep.mubr.f32.mxu1 %v495_v17  ;;  %645 = vmatmul.mubr.f32.gmra.mrb[10].mxu0 %v492_v40  ;;  %v920_v43 = vadd.f32 -1.0, %v1350_v12  ;;  %v496_v28 = vsel %vm416_vm10, %v1558_v39, %v919_v41 }
 0x15a   :  { %v1354_v45 = vpop.eup %1353  ;;  %730 = vmatmul.mubr.f32.gmra.mrb[10].mxu1 %v494_v29  ;;  %v922_v60 = vadd.f32 -1.0, %v1352_v42  ;;  %v498_v47 = vsel %vm418_vm11, %v1560_v16, %v921_v44  ;;  %1308 = vmatprep.subr.bf16.mxu1 %v1279_v61 }
 0x15b   :  { %v1356_v46 = vpop.eup %1355  ;;  %v497_v33 = vsel %vm417_vm8, %v1564_v48, %v920_v43  ;;  %v923_v51 = vadd.f32 -1.0, %v1354_v45  ;;  %1282 = vmatpush3.bf16.msra.mxu0 %v1279_v61  ;;  %1316 = vmatpush3.bf16.msra.mxu1 %v1279_v61 }
 0x15c   :  { %v1358_v23 = vpop.eup %1357  ;;  %649 = vmatprep.mubr.f32.mxu0 %v497_v33  ;;  %v499_v49 = vsel %vm419_vm9, %v1568_v50, %v922_v60  ;;  %v925_v48 = vadd.f32 -1.0, %v1356_v46 }
 0x15d   :  { %v1360_v52 = vpop.eup %1359  ;;  %734 = vmatprep.mubr.f32.mxu1 %v499_v49  ;;  %650 = vmatmul.mubr.f32.gmra.mrb[12].mxu0 %v496_v28  ;;  %v924_v54 = vadd.f32 -1.0, %v1358_v23  ;;  %v500_v50 = vsel %vm420_vm14, %v1571_v53, %v923_v51  ;;  %v773_v53 = vld [vmem:[%s1685_s5 + $0x20] sm:$0xff] }
 0x15e   :  { %735 = vmatmul.mubr.f32.gmra.mrb[12].mxu1 %v498_v47  ;;  %v926_v55 = vadd.f32 -1.0, %v1360_v52  ;;  %v502_v16 = vsel %vm422_vm15, %v1574_v58, %v925_v48  ;;  %v774_v58 = vld [vmem:[%s1685_s5 + $0x28] sm:$0xff] }
 0x15f   :  { %v501_v56 = vsel %vm421_vm12, %v1578_v63, %v924_v54  ;;  %v1283_v62 = vpack.c.bf16 %v774_v58, %v773_v53  ;;  %v775_v63 = vld [vmem:[%s1685_s5 + $0x30] sm:$0xff] }
 0x160   :  { %654 = vmatprep.mubr.f32.mxu0 %v501_v56  ;;  %v503_v39 = vsel %vm423_vm13, %v1582_v2, %v926_v55  ;;  %v1287_v1 = vpack.c.bf16 %v776_v0, %v775_v63  ;;  %v777_v2 = vld [vmem:[%s1685_s5 + $0x40] sm:$0xff] }
 0x161   :  { %739 = vmatprep.mubr.f32.mxu1 %v503_v39  ;;  %655 = vmatmul.mubr.f32.gmra.mrb[14].mxu0 %v500_v50  ;;  %v1291_v4 = vpack.c.bf16 %v778_v3, %v777_v2  ;;  %v932_v3 = vld [vmem:[%s1686_s6] ss:$0 sm:$0xff] }
 0x162   :  { %740 = vmatmul.mubr.f32.gmra.mrb[14].mxu1 %v502_v16  ;;  %1284 = vmatprep.subr.bf16.mxu0 %v1283_v62 }
 0x163   :  { %1309 = vmatprep.subr.bf16.mxu1 %v1283_v62  ;;  %1286 = vmatpush3.bf16.msra.mxu0 %v1283_v62 }
 0x164   :  { %1317 = vmatpush3.bf16.msra.mxu1 %v1283_v62  ;;  %1288 = vmatprep.subr.bf16.mxu0 %v1287_v1 }
 0x165   :  { %1310 = vmatprep.subr.bf16.mxu1 %v1287_v1 }
 0x167   :  { %1290 = vmatpush3.bf16.msra.mxu0 %v1287_v1 }
 0x168   :  { %1318 = vmatpush3.bf16.msra.mxu1 %v1287_v1  ;;  %1292 = vmatprep.subr.bf16.mxu0 %v1291_v4 }
 0x169   :  { %1311 = vmatprep.subr.bf16.mxu1 %v1291_v4 }
 0x16b   :  { %1294 = vmatpush3.bf16.msra.mxu0 %v1291_v4 }
 0x16c   :  { %1319 = vmatpush3.bf16.msra.mxu1 %v1291_v4  ;;  %1296 = vmatprep.subr.bf16.mxu0 %v1295_v11 }
 0x16d   :  { %1312 = vmatprep.subr.bf16.mxu1 %v1295_v11 }
 0x16f   :  { %1298 = vmatpush3.bf16.msra.mxu0 %v1295_v11 }
 0x170   :  { %1320 = vmatpush3.bf16.msra.mxu1 %v1295_v11  ;;  %1300 = vmatprep.subr.bf16.mxu0 %v1299_v6 }
 0x171   :  { %1313 = vmatprep.subr.bf16.mxu1 %v1299_v6 }
 0x173   :  { %1302 = vmatpush3.bf16.msra.mxu0 %v1299_v6 }
 0x174   :  { %1321 = vmatpush3.bf16.msra.mxu1 %v1299_v6  ;;  %1304 = vmatprep.subr.bf16.mxu0 %v1303_v19 }
 0x175   :  { %1314 = vmatprep.subr.bf16.mxu1 %v1303_v19 }
 0x177   :  { %1306 = vmatpush3.bf16.msra.mxu0 %v1303_v19 }
 0x178   :  { %1322 = vmatpush3.bf16.msra.mxu1 %v1303_v19 }
 0x228   :  { %v969_v20 = vpop.f32.mrb[8].mxu0 }
 0x229   :  { %v1013_v7 = vpop.f32.mrb[8].mxu1  ;;  %v970_v22 = vpop.f32.mrb[9].mxu0 }
 0x22a   :  { %v971_v24 = vadd.f32 %v970_v22, %v969_v20  ;;  %v1014_v25 = vpop.f32.mrb[9].mxu1 }
 0x22b   :  { %v1015_v26 = vadd.f32 %v1014_v25, %v1013_v7 }
 0x22c   :  { %v642_v27 = vadd.f32 %v971_v24, %v927_v21  ;;  %v972_v30 = vpop.f32.mrb[10].mxu0 }
 0x22d   :  { %v1016_v31 = vpop.f32.mrb[10].mxu1  ;;  %v973_v32 = vpop.f32.mrb[11].mxu0 }
 0x22e   :  { %v727_v34 = vadd.f32 %v1015_v26, %v642_v27  ;;  %v974_v35 = vadd.f32 %v973_v32, %v972_v30  ;;  %v1017_v36 = vpop.f32.mrb[11].mxu1 }
 0x22f   :  { %v1018_v37 = vadd.f32 %v1017_v36, %v1016_v31 }
 0x230   :  { %v749_v13 = vmin.f32 %v727_v34, 0.0  ;;  %v647_v9 = vadd.f32 %v974_v35, %v927_v21  ;;  %v975_v38 = vpop.f32.mrb[12].mxu0  ;;  %vm745_vm0 = vcmp.gt.f32.partialorder %v727_v34, 0.0 }
 0x231   :  { %v1019_v12 = vpop.f32.mrb[12].mxu1  ;;  %v976_v17 = vpop.f32.mrb[13].mxu0 }
 0x232   :  { %v753_v40 = vmul.f32 1.442695, %v749_v13  ;;  %v732_v41 = vadd.f32 %v1018_v37, %v647_v9  ;;  %v977_v42 = vadd.f32 %v976_v17, %v975_v38  ;;  %v1020_v29 = vpop.f32.mrb[13].mxu1 }
 0x233   :  { %v1021_v43 = vadd.f32 %v1020_v29, %v1019_v12 }
 0x234   :  { %1361 = vpow2.f32 %v753_v40  ;;  %v750_v44 = vmin.f32 %v732_v41, 0.0  ;;  %v652_v45 = vadd.f32 %v977_v42, %v927_v21  ;;  %v978_v60 = vpop.f32.mrb[14].mxu0  ;;  %vm746_vm1 = vcmp.gt.f32.partialorder %v732_v41, 0.0 }
 0x235   :  { %v1022_v46 = vpop.f32.mrb[14].mxu1  ;;  %v979_v33 = vpop.f32.mrb[15].mxu0 }
 0x236   :  { %v755_v23 = vmul.f32 1.442695, %v750_v44  ;;  %v737_v49 = vadd.f32 %v1021_v43, %v652_v45  ;;  %v980_v28 = vadd.f32 %v979_v33, %v978_v60  ;;  %v1023_v51 = vpop.f32.mrb[15].mxu1 }
 0x237   :  { %v1024_v52 = vadd.f32 %v1023_v51, %v1022_v46 }
 0x238   :  { %1363 = vpow2.f32 %v755_v23  ;;  %v751_v47 = vmin.f32 %v737_v49, 0.0  ;;  %v657_v54 = vadd.f32 %v980_v28, %v927_v21  ;;  %vm747_vm2 = vcmp.gt.f32.partialorder %v737_v49, 0.0 }
 0x23a   :  { %v757_v48 = vmul.f32 1.442695, %v751_v47  ;;  %v742_v55 = vadd.f32 %v1024_v52, %v657_v54 }
 0x23c   :  { %1365 = vpow2.f32 %v757_v48  ;;  %v752_v56 = vmin.f32 %v742_v55, 0.0  ;;  %vm748_vm3 = vcmp.gt.f32.partialorder %v742_v55, 0.0 }
 0x23e   :  { %v1362_v39 = vpop.eup %1361  ;;  %v759_v50 = vmul.f32 1.442695, %v752_v56 }
 0x23f   :  { %v928_v16 = vadd.f32 -1.0, %v1362_v39 }
 0x240   :  { %1367 = vpow2.f32 %v759_v50 }
 0x241   :  { %v765_v57 = vsel %vm745_vm0, %v727_v34, %v928_v16 }
 0x242   :  { %v1364_v59 = vpop.eup %1363  ;;  %1077 = vmatprep.mubr.f32.mxu0 %v765_v57 }
 0x243   :  { %v929_v61 = vadd.f32 -1.0, %v1364_v59 }
 0x245   :  { %v766_v53 = vsel %vm746_vm1, %v732_v41, %v929_v61 }
 0x246   :  { %v1366_v58 = vpop.eup %1365  ;;  %1078 = vmatmul.mubr.f32.vlgmr.msra.gmra.mrb[16].mxu0 %v766_v53 }
 0x247   :  { %v930_v62 = vadd.f32 -1.0, %v1366_v58 }
 0x249   :  { %v767_v63 = vsel %vm747_vm2, %v737_v49, %v930_v62 }
 0x24a   :  { %v1368_v0 = vpop.eup %1367  ;;  %1080 = vmatprep.mubr.f32.mxu1 %v767_v63 }
 0x24b   :  { %v931_v1 = vadd.f32 -1.0, %v1368_v0 }
 0x24d   :  { %v768_v2 = vsel %vm748_vm3, %v742_v55, %v931_v1 }
 0x24e   :  { %1081 = vmatmul.mubr.f32.vlgmr.msra.gmra.mrb[16].mxu1 %v768_v2 }
 0x319   :  { %v1079_v4 = vpop.f32.mrb[16].mxu0 }
 0x31a   :  { %v864_v5 = vadd.f32 %v1079_v4, %v932_v3  ;;  %v858_v8 = vpop.f32.mrb[17].mxu0 }
 0x31b   :  { %v859_v10 = vadd.f32 %v932_v3, %v858_v8 }
 0x31c   :  { %v882_v11 = vmin.f32 %v864_v5, 0.0  ;;  %vm878_vm4 = vcmp.gt.f32.partialorder %v864_v5, 0.0 }
 0x31d   :  { %v881_v14 = vmin.f32 %v859_v10, 0.0  ;;  %vm877_vm5 = vcmp.gt.f32.partialorder %v859_v10, 0.0 }
 0x31e   :  { %v887_v6 = vmul.f32 1.442695, %v882_v11 }
 0x31f   :  { %v885_v15 = vmul.f32 1.442695, %v881_v14 }
 0x320   :  { %1369 = vpow2.f32 %v887_v6 }
 0x321   :  { %1371 = vpow2.f32 %v885_v15  ;;  %v1082_v18 = vpop.f32.mrb[16].mxu1 }
 0x322   :  { %v874_v19 = vadd.f32 %v1082_v18, %v932_v3  ;;  %v868_v20 = vpop.f32.mrb[17].mxu1 }
 0x323   :  { %v869_v7 = vadd.f32 %v932_v3, %v868_v20 }
 0x324   :  { %v884_v21 = vmin.f32 %v874_v19, 0.0  ;;  %vm880_vm6 = vcmp.gt.f32.partialorder %v874_v19, 0.0 }
 0x325   :  { %v883_v22 = vmin.f32 %v869_v7, 0.0  ;;  %vm879_vm7 = vcmp.gt.f32.partialorder %v869_v7, 0.0 }
 0x326   :  { %v891_v24 = vmul.f32 1.442695, %v884_v21 }
 0x327   :  { %v889_v25 = vmul.f32 1.442695, %v883_v22 }
 0x328   :  { %1373 = vpow2.f32 %v891_v24 }
 0x329   :  { %1375 = vpow2.f32 %v889_v25 }
 0x32a   :  { %v1370_v26 = vpop.eup %1369 }
 0x32b   :  { %v1372_v27 = vpop.eup %1371  ;;  %v934_v30 = vadd.f32 -1.0, %v1370_v26 }
 0x32c   :  { %v933_v31 = vadd.f32 -1.0, %v1372_v27 }
 0x32d   :  { %v898_v32 = vsel %vm878_vm4, %v864_v5, %v934_v30 }
 0x32e   :  { %902 = vst [vmem:[%s1687_s7 + $0x8] sm:$0xff] %v898_v32  ;;  %v897_v34 = vsel %vm877_vm5, %v859_v10, %v933_v31 }
 0x32f   :  { %901 = vst [vmem:[%s1687_s7] sm:$0xff] %v897_v34 }
 0x332   :  { %v1374_v35 = vpop.eup %1373 }
 0x333   :  { %v1376_v36 = vpop.eup %1375  ;;  %v936_v37 = vadd.f32 -1.0, %v1374_v35 }
 0x334   :  { %v935_v13 = vadd.f32 -1.0, %v1376_v36 }
 0x335   :  { %v900_v9 = vsel %vm880_vm6, %v874_v19, %v936_v37 }
 0x336   :  { %904 = vst [vmem:[%s1687_s7 + $0x18] sm:$0xff] %v900_v9  ;;  %v899_v38 = vsel %vm879_vm7, %v869_v7, %v935_v13 }
 0x337   :  { %903 = vst [vmem:[%s1687_s7 + $0x10] sm:$0xff] %v899_v38 }
 0x338   :  { %909 = vsyncpa [#allocation3], 1 }
 0x339   :  { %910 = vsyncpa [#allocation5], 1 }

</bundles_post_ra>
